<compile_context>
chip_gen: v7x
topology: tpu7x:2x2x1
jax: 0.10.0
libtpu: 0.0.40
codegen_flags: <defaults>
</compile_context>

<pallas_src>
import jax
import jax.numpy as jnp
from jax.experimental import pallas as pl
from jax.experimental.pallas import tpu as pltpu


# ----------------------------------------------------------------------------- kernel
def _neutral_ad_kernel(x_ref, w1c_ref, b1c_ref, wf_ref, bf_ref,
                       we2bd_ref, be2c_ref, out_ref):
    x = x_ref[...]                                               # (Bt, D) f32

    # trans layer-1 for all K nets in one lane-dense matmul: (Bt, K*H)
    h = jnp.dot(x, w1c_ref[...], preferred_element_type=jnp.float32) + b1c_ref[...]
    h = jnp.maximum(h, 0.0)

    # fused [trans layer-2 + residual + encoder layer-1] for ALL K+1 views.
    # concat at the K*H (=128) lane boundary -> no cross-lane shuffles.
    lhs = jnp.concatenate([h, x], axis=1)                        # (Bt, K*H + D)
    e = jnp.dot(lhs, wf_ref[...], preferred_element_type=jnp.float32) + bf_ref[...]
    e = jnp.maximum(e, 0.0)                                      # (Bt, (K+1)*He)

    # encoder layer-2, block-diagonal -> lane-dense (Bt, (K+1)*Z) output slab
    z = jnp.dot(e, we2bd_ref[...], preferred_element_type=jnp.float32) + be2c_ref[...]
    out_ref[...] = z.astype(out_ref.dtype)


# ----------------------------------------------------------------------- weight packing
def _pack_weights(params):
    """One-time host/XLA-side packing of the module weights for the fused kernel."""
    W1, B1, W2, B2, WE1, BE1, WE2, BE2 = params
    K, D, H = W1.shape
    He = WE1.shape[1]
    Z = WE2.shape[1]

    # trans layer-1, lane-dense: cols [k*H:(k+1)*H) = W1[k]
    W1c = jnp.concatenate([W1[i] for i in range(K)], axis=1)      # (D, K*H)
    B1c = B1.reshape(1, K * H)                                    # (1, K*H)

    # fused [trans layer-2 + residual + encoder layer-1]
    #   LHS rows: [h_0 .. h_{K-1}, x]
    #   cols [0:He)              -> view 0:      x @ WE1 + be1
    #   cols [(k+1)He:(k+2)He)   -> view k+1:    h_k @ (W2[k]@WE1) + x @ WE1
    #                                            + (b2[k]@WE1 + be1)
    Wf = jnp.zeros((K * H + D, (K + 1) * He), jnp.float32)
    bf = jnp.zeros((1, (K + 1) * He), jnp.float32)
    Wf = Wf.at[K * H:, 0:He].set(WE1)
    bf = bf.at[:, 0:He].set(BE1)
    for k in range(K):
        c0 = (k + 1) * He
        Wf = Wf.at[k * H:(k + 1) * H, c0:c0 + He].set(W2[k] @ WE1)
        Wf = Wf.at[K * H:, c0:c0 + He].set(WE1)
        bf = bf.at[:, c0:c0 + He].set(B2[k, 0] @ WE1 + BE1[0])

    # encoder layer-2 as block-diagonal, column order == PyTorch view order
    WE2bd = jnp.zeros(((K + 1) * He, (K + 1) * Z), jnp.float32)
    for t in range(K + 1):
        WE2bd = WE2bd.at[t * He:(t + 1) * He, t * Z:(t + 1) * Z].set(WE2)
    BE2c = jnp.tile(BE2, (1, K + 1))                              # (1, (K+1)*Z)

    return W1c, B1c, Wf, bf, WE2bd, BE2c


def _round_up(v, m):
    return ((v + m - 1) // m) * m


# ------------------------------------------------------------------------------ wrapper
def tab_neutral_ad_forward(x, params, *, b_tile=1024):
    """x: (B, D) float32 -> zs: (B, K+1, Z) float32."""
    W1 = params[0]
    K, D, H = W1.shape
    He = params[4].shape[1]
    Z = params[6].shape[1]
    B = x.shape[0]

    W1c, B1c, Wf, bf, WE2bd, BE2c = _pack_weights(params)

    # Batch tiling: big tiles (per-step overhead + HBM writeback dominate this tiny
    # kernel). When B >= 512, force >= 2 grid steps so the "parallel" batch axis can
    # shard across v7x's 2 TensorCores (harmless extra step on v5e/v6e).
    if B <= b_tile and B < 512:
        Bt, Bpad = B, B                       # single step; block == full dim is legal
    else:
        Bt = min(b_tile, _round_up(pl.cdiv(B, 2), 8))
        Bt = _round_up(Bt, 8)
        Bpad = _round_up(B, Bt)
    xp = x if Bpad == B else jnp.pad(x, ((0, Bpad - B), (0, 0)))

    const2 = lambda i: (0, 0)
    out = pl.pallas_call(
        _neutral_ad_kernel,
        out_shape=jax.ShapeDtypeStruct((Bpad, (K + 1) * Z), jnp.float32),
        grid_spec=pltpu.PrefetchScalarGridSpec(
            num_scalar_prefetch=0,
            grid=(Bpad // Bt,),
            in_specs=[
                pl.BlockSpec((Bt, D), lambda i: (i, 0)),              # x batch tile
                pl.BlockSpec((D, K * H), const2),                     # packed W1 (resident)
                pl.BlockSpec((1, K * H), const2),                     # packed b1
                pl.BlockSpec((K * H + D, (K + 1) * He), const2),      # fused W2·WE1 (+x rows)
                pl.BlockSpec((1, (K + 1) * He), const2),              # fused bias
                pl.BlockSpec(((K + 1) * He, (K + 1) * Z), const2),    # block-diag WE2
                pl.BlockSpec((1, (K + 1) * Z), const2),               # tiled be2
            ],
            out_specs=pl.BlockSpec((Bt, (K + 1) * Z), lambda i: (i, 0)),
        ),
        compiler_params=pltpu.CompilerParams(
            dimension_semantics=("parallel",),
            vmem_limit_bytes=48 << 20),
    )(xp, W1c, B1c, Wf, bf, WE2bd, BE2c)

    # glue: pure reshape (no transpose) back to the PyTorch layout (B, K+1, Z)
    return out[:B].reshape(B, K + 1, Z)


# ---------------------------------------------------------------------------- reference
def reference_forward(x, params):
    """Pure-JAX reference matching the PyTorch module semantics (residual views)."""
    W1, B1, W2, B2, WE1, BE1, WE2, BE2 = params
    K = W1.shape[0]
    x_T = []
    for i in range(K):
        h = jnp.maximum(x @ W1[i] + B1[i, 0], 0.0)
        mask = h @ W2[i] + B2[i, 0]
        x_T.append(mask + x)                                      # residual
    x_cat = jnp.concatenate([x[:, None, :], jnp.stack(x_T, axis=1)], axis=1)
    flat = x_cat.reshape(-1, x.shape[-1])
    e = jnp.maximum(flat @ WE1 + BE1[0], 0.0)
    z = e @ WE2 + BE2[0]
    return z.reshape(x.shape[0], K + 1, -1)


def make_params(key, x_dim, num_trans, h_trans, h_enc, z_dim):
    ks = jax.random.split(key, 8)
    s = lambda fan_in: 1.0 / jnp.sqrt(fan_in)
    W1 = jax.random.normal(ks[0], (num_trans, x_dim, h_trans), jnp.float32) * s(x_dim)
    B1 = jax.random.normal(ks[1], (num_trans, 1, h_trans), jnp.float32) * 0.01
    W2 = jax.random.normal(ks[2], (num_trans, h_trans, x_dim), jnp.float32) * s(h_trans)
    B2 = jax.random.normal(ks[3], (num_trans, 1, x_dim), jnp.float32) * 0.01
    WE1 = jax.random.normal(ks[4], (x_dim, h_enc), jnp.float32) * s(x_dim)
    BE1 = jax.random.normal(ks[5], (1, h_enc), jnp.float32) * 0.01
    WE2 = jax.random.normal(ks[6], (h_enc, z_dim), jnp.float32) * s(h_enc)
    BE2 = jax.random.normal(ks[7], (1, z_dim), jnp.float32) * 0.01
    return (W1, B1, W2, B2, WE1, BE1, WE2, BE2)


if __name__ == "__main__":
    D = 16          # x_dim (tabular features)
    K = 4           # num_trans
    H = 32          # transformation hidden width  (K*H = 128 -> full lane width)
    HE = 32         # encoder hidden width
    Z = 2 * D       # z_dim rule: x_dim < 32 -> 2 * x_dim = 32

    key = jax.random.PRNGKey(0)
    kx, kp, kx2 = jax.random.split(key, 3)
    params = make_params(kp, D, K, H, HE, Z)

    # single-grid-step path
    B = 8
    x = jax.random.normal(kx, (B, D), jnp.float32)
    zs = jax.block_until_ready(tab_neutral_ad_forward(x, params))
    ref = reference_forward(x, params)
    assert zs.shape == (B, K + 1, Z), zs.shape
    assert jnp.allclose(zs, ref, atol=2e-4, rtol=2e-4), "mismatch vs reference (B=8)"

    # multi-step grid + batch-padding path (small b_tile override just to exercise it)
    B2 = 40
    x2 = jax.random.normal(kx2, (B2, D), jnp.float32)
    zs2 = jax.block_until_ready(tab_neutral_ad_forward(x2, params, b_tile=16))
    ref2 = reference_forward(x2, params)
    assert zs2.shape == (B2, K + 1, Z), zs2.shape
    assert jnp.allclose(zs2, ref2, atol=2e-4, rtol=2e-4), "mismatch vs reference (B=40)"

    print("KERNEL_OK")
</pallas_src>

<mosaic_0001>
module attributes {stable_mosaic.version = 11 : i64} {
  func.func @_neutral_ad_kernel(%arg0: i32, %arg1: memref<8x16xf32, #tpu.memory_space<vmem>>, %arg2: memref<16x128xf32, #tpu.memory_space<vmem>>, %arg3: memref<1x128xf32, #tpu.memory_space<vmem>>, %arg4: memref<144x160xf32, #tpu.memory_space<vmem>>, %arg5: memref<1x160xf32, #tpu.memory_space<vmem>>, %arg6: memref<160x160xf32, #tpu.memory_space<vmem>>, %arg7: memref<1x160xf32, #tpu.memory_space<vmem>>, %arg8: memref<8x160xf32, #tpu.memory_space<vmem>>) attributes {dimension_semantics = [#tpu.dimension_semantics<parallel>], iteration_bounds = array<i64: 1>, scalar_prefetch = 0 : i64, scratch_operands = 0 : i64, tpu.core_type = #tpu.core_type<tc>, window_params = [{transform_indices = @transform_0, window_bounds = array<i64: 8, 16>}, {pipeline_mode = #tpu.pipeline_mode<synchronous>, transform_indices = @transform_1, window_bounds = array<i64: 16, 128>}, {pipeline_mode = #tpu.pipeline_mode<synchronous>, transform_indices = @transform_2, window_bounds = array<i64: 1, 128>}, {pipeline_mode = #tpu.pipeline_mode<synchronous>, transform_indices = @transform_3, window_bounds = array<i64: 144, 160>}, {pipeline_mode = #tpu.pipeline_mode<synchronous>, transform_indices = @transform_4, window_bounds = array<i64: 1, 160>}, {pipeline_mode = #tpu.pipeline_mode<synchronous>, transform_indices = @transform_5, window_bounds = array<i64: 160, 160>}, {pipeline_mode = #tpu.pipeline_mode<synchronous>, transform_indices = @transform_6, window_bounds = array<i64: 1, 160>}, {transform_indices = @transform_7, window_bounds = array<i64: 8, 160>}]} {
    %c0 = arith.constant 0 : index
    %c0_0 = arith.constant 0 : index
    %0 = vector.load %arg1[%c0, %c0_0] : memref<8x16xf32, #tpu.memory_space<vmem>>, vector<8x16xf32>
    %c0_1 = arith.constant 0 : index
    %c0_2 = arith.constant 0 : index
    %1 = vector.load %arg2[%c0_1, %c0_2] : memref<16x128xf32, #tpu.memory_space<vmem>>, vector<16x128xf32>
    %cst = arith.constant dense<0.000000e+00> : vector<8x128xf32>
    %2 = tpu.matmul %0, %1, %cst {dimension_numbers = #tpu.dot_dimension_numbers<[1], [0], [0], [1], [0, 0, 1, 1], [], []>} : vector<8x16xf32>, vector<16x128xf32>, vector<8x128xf32> -> vector<8x128xf32>
    %c0_3 = arith.constant 0 : index
    %c0_4 = arith.constant 0 : index
    %3 = vector.load %arg3[%c0_3, %c0_4] : memref<1x128xf32, #tpu.memory_space<vmem>>, vector<1x128xf32>
    %4 = vector.broadcast %3 : vector<1x128xf32> to vector<8x128xf32>
    %5 = arith.addf %2, %4 : vector<8x128xf32>
    %cst_5 = arith.constant 0.000000e+00 : f32
    %6 = vector.broadcast %cst_5 : f32 to vector<8x128xf32>
    %7 = arith.maximumf %5, %6 : vector<8x128xf32>
    %8 = tpu.concatenate %7, %0 in 1 : vector<8x128xf32>, vector<8x16xf32> -> vector<8x144xf32>
    %c0_6 = arith.constant 0 : index
    %c0_7 = arith.constant 0 : index
    %9 = vector.load %arg4[%c0_6, %c0_7] : memref<144x160xf32, #tpu.memory_space<vmem>>, vector<144x160xf32>
    %cst_8 = arith.constant dense<0.000000e+00> : vector<8x160xf32>
    %10 = tpu.matmul %8, %9, %cst_8 {dimension_numbers = #tpu.dot_dimension_numbers<[1], [0], [0], [1], [0, 0, 1, 1], [], []>} : vector<8x144xf32>, vector<144x160xf32>, vector<8x160xf32> -> vector<8x160xf32>
    %c0_9 = arith.constant 0 : index
    %c0_10 = arith.constant 0 : index
    %11 = vector.load %arg5[%c0_9, %c0_10] : memref<1x160xf32, #tpu.memory_space<vmem>>, vector<1x160xf32>
    %12 = vector.broadcast %11 : vector<1x160xf32> to vector<8x160xf32>
    %13 = arith.addf %10, %12 : vector<8x160xf32>
    %cst_11 = arith.constant 0.000000e+00 : f32
    %14 = vector.broadcast %cst_11 : f32 to vector<8x160xf32>
    %15 = arith.maximumf %13, %14 : vector<8x160xf32>
    %c0_12 = arith.constant 0 : index
    %c0_13 = arith.constant 0 : index
    %16 = vector.load %arg6[%c0_12, %c0_13] : memref<160x160xf32, #tpu.memory_space<vmem>>, vector<160x160xf32>
    %cst_14 = arith.constant dense<0.000000e+00> : vector<8x160xf32>
    %17 = tpu.matmul %15, %16, %cst_14 {dimension_numbers = #tpu.dot_dimension_numbers<[1], [0], [0], [1], [0, 0, 1, 1], [], []>} : vector<8x160xf32>, vector<160x160xf32>, vector<8x160xf32> -> vector<8x160xf32>
    %c0_15 = arith.constant 0 : index
    %c0_16 = arith.constant 0 : index
    %18 = vector.load %arg7[%c0_15, %c0_16] : memref<1x160xf32, #tpu.memory_space<vmem>>, vector<1x160xf32>
    %19 = vector.broadcast %18 : vector<1x160xf32> to vector<8x160xf32>
    %20 = arith.addf %17, %19 : vector<8x160xf32>
    %c0_17 = arith.constant 0 : index
    %c0_18 = arith.constant 0 : index
    %21 = vector.load %arg8[%c0_17, %c0_18] : memref<8x160xf32, #tpu.memory_space<vmem>>, vector<8x160xf32>
    tpu.vector_store %arg8[%c0_17, %c0_18], %20 {strides = array<i32>} : memref<8x160xf32, #tpu.memory_space<vmem>>, vector<8x160xf32>,
    return
  }
  func.func @transform_0(%arg0: i32) -> (i32, i32) {
    %c0_i32 = arith.constant 0 : i32
    %c0_i32_0 = arith.constant 0 : i32
    return %arg0, %c0_i32 : i32, i32
  }
  func.func @transform_1(%arg0: i32) -> (i32, i32) {
    %c0_i32 = arith.constant 0 : i32
    %c0_i32_0 = arith.constant 0 : i32
    %c0_i32_1 = arith.constant 0 : i32
    return %c0_i32, %c0_i32_0 : i32, i32
  }
  func.func @transform_2(%arg0: i32) -> (i32, i32) {
    %c0_i32 = arith.constant 0 : i32
    %c0_i32_0 = arith.constant 0 : i32
    %c0_i32_1 = arith.constant 0 : i32
    return %c0_i32, %c0_i32_0 : i32, i32
  }
  func.func @transform_3(%arg0: i32) -> (i32, i32) {
    %c0_i32 = arith.constant 0 : i32
    %c0_i32_0 = arith.constant 0 : i32
    %c0_i32_1 = arith.constant 0 : i32
    return %c0_i32, %c0_i32_0 : i32, i32
  }
  func.func @transform_4(%arg0: i32) -> (i32, i32) {
    %c0_i32 = arith.constant 0 : i32
    %c0_i32_0 = arith.constant 0 : i32
    %c0_i32_1 = arith.constant 0 : i32
    return %c0_i32, %c0_i32_0 : i32, i32
  }
  func.func @transform_5(%arg0: i32) -> (i32, i32) {
    %c0_i32 = arith.constant 0 : i32
    %c0_i32_0 = arith.constant 0 : i32
    %c0_i32_1 = arith.constant 0 : i32
    return %c0_i32, %c0_i32_0 : i32, i32
  }
  func.func @transform_6(%arg0: i32) -> (i32, i32) {
    %c0_i32 = arith.constant 0 : i32
    %c0_i32_0 = arith.constant 0 : i32
    %c0_i32_1 = arith.constant 0 : i32
    return %c0_i32, %c0_i32_0 : i32, i32
  }
  func.func @transform_7(%arg0: i32) -> (i32, i32) {
    %c0_i32 = arith.constant 0 : i32
    %c0_i32_0 = arith.constant 0 : i32
    return %arg0, %c0_i32 : i32, i32
  }
}

</mosaic_0001>

<bundles_post_ra>
// kernel: tpu_custom_call.1
= control target key start
LH: loop header
LB: loop body
LE: loop exit
PB: predicated region body
PF: predicated region fallthrough
CT: control target
= control target key end

     0   :  { %12 = vsyncpa [#allocation3], 0  ;;  %s778_s0 = inlined_call_operand.hbm [shape: f32[8,16], index: 0, kind: input, shape index: {}]   ;;  %s779_s1 = inlined_call_operand.hbm [shape: f32[16,128], index: 1, kind: input, shape index: {}]   ;;  %s780_s2 = inlined_call_operand.vmem [shape: f32[1,128], index: 2, kind: input, shape index: {}]   ;;  %s781_s3 = inlined_call_operand.hbm [shape: f32[144,160], index: 3, kind: input, shape index: {}]   ;;  %s782_s4 = inlined_call_operand.vmem [shape: f32[1,160], index: 4, kind: input, shape index: {}]   ;;  %s783_s5 = inlined_call_operand.hbm [shape: f32[160,160], index: 5, kind: input, shape index: {}]   ;;  %s784_s6 = inlined_call_operand.vmem [shape: f32[1,160], index: 6, kind: input, shape index: {}]   ;;  %s785_s7 = inlined_call_operand.hbm [shape: f32[8,160], index: 7, kind: output, shape index: {}]  }
   0x1   :  { %13 = vsyncpa [#allocation6], 0 }
   0x2   :  { %14 = vsyncpa [#allocation9], 0 }
   0x3   :  { %15 = vsyncpa [#allocation4], 0  ;;  %s655_s24 = smov [#allocation5]   ;;  %s537_s28 = scalar_lea.hbm %s779_s1, 256 }
   0x4   :  { %s31_s25 = sshll.u32 %s655_s24, 4  ;;  %p538_p0 = scmp.ne.s32.totalorder %s779_s1, %s537_s28  ;;  %s32_s25 = int_to_ptr.vmem [resolvable:$true] %s31_s25 }
   0x5   :  { %p541_p1 = scmp.lt.u32.totalorder %s537_s28, %s779_s1 }
   0x7   :  { %p543_p2 = pnand %p541_p1, %p538_p0 }
   0x9   :  { %546 = shalt.err (!%p543_p2)
}
   0xa   :  { %s547_s10 = scalar_lea.vmem %s32_s25, 256  ;;  %p552_p4 = scmp.lt.s32.totalorder %s32_s25, %s32_s25 }
   0xb   :  { %p548_p3 = scmp.ne.s32.totalorder %s32_s25, %s547_s10  ;;  %p553_p5 = scmp.lt.s32.totalorder %s547_s10, %s547_s10 }
   0xd   :  { %p554_p6 = por %p553_p5, %p552_p4 }
   0xf   :  { %p555_p7 = pnand %p554_p6, %p548_p3 }
  0x11   :  { %558 = shalt.err (!%p555_p7)
}
  0x12   :  { %s656_s11 = smov 128   ;;  %s657_s12 = smov 8  }
  0x13   :  { %37 = dma.hbm_to_vmem [thread:$0]  %s779_s1, 256, %s32_s25, [#allocation6], %s656_s11, %s656_s11, %s657_s12  }
  0x14   :  { %s658_s15 = smov [#allocation2]   ;;  %s659_s17 = smov [#allocation7]  }
  0x15   :  { %s22_s16 = sshll.u32 %s658_s15, 4  ;;  %s45_s18 = sshll.u32 %s659_s17, 4  ;;  %s23_s16 = int_to_ptr.vmem [resolvable:$true] %s22_s16  ;;  %s46_s18 = int_to_ptr.vmem [resolvable:$true] %s45_s18 }
  0x16   :  { %s559_s21 = scalar_lea.hbm %s778_s0, 128 }
  0x17   :  { %p560_p8 = scmp.ne.s32.totalorder %s778_s0, %s559_s21  ;;  %p563_p9 = scmp.lt.u32.totalorder %s559_s21, %s778_s0 }
  0x19   :  { %p565_p10 = pnand %p563_p9, %p560_p8 }
  0x1b   :  { %568 = shalt.err (!%p565_p10)
}
  0x1c   :  { %s569_s1 = scalar_lea.vmem %s23_s16, 128  ;;  %p574_p12 = scmp.lt.s32.totalorder %s23_s16, %s23_s16 }
  0x1d   :  { %p570_p11 = scmp.ne.s32.totalorder %s23_s16, %s569_s1  ;;  %p575_p13 = scmp.lt.s32.totalorder %s569_s1, %s569_s1 }
  0x1f   :  { %p576_p0 = por %p575_p13, %p574_p12 }
  0x21   :  { %p577_p1 = pnand %p576_p0, %p570_p11 }
  0x23   :  { %580 = shalt.err (!%p577_p1)
}
  0x24   :  { %25 = dma.hbm_to_vmem [thread:$0]  %s778_s0, 128, %s23_s16, [#allocation3]  }
  0x25   :  { %s581_s30 = scalar_lea.hbm %s781_s3, 4608 }
  0x26   :  { %p582_p2 = scmp.ne.s32.totalorder %s781_s3, %s581_s30  ;;  %p585_p3 = scmp.lt.u32.totalorder %s581_s30, %s781_s3 }
  0x28   :  { %p587_p4 = pnand %p585_p3, %p582_p2 }
  0x2a   :  { %590 = shalt.err (!%p587_p4)
}
  0x2b   :  { %s591_s12 = scalar_lea.vmem %s46_s18, 4608  ;;  %p596_p6 = scmp.lt.s32.totalorder %s46_s18, %s46_s18 }
  0x2c   :  { %p592_p5 = scmp.ne.s32.totalorder %s46_s18, %s591_s12  ;;  %p597_p7 = scmp.lt.s32.totalorder %s591_s12, %s591_s12 }
  0x2e   :  { %p598_p8 = por %p597_p7, %p596_p6 }
  0x30   :  { %p599_p9 = pnand %p598_p8, %p592_p5 }
  0x32   :  { %602 = shalt.err (!%p599_p9)
}
  0x33   :  { %s660_s0 = smov 256   ;;  %s661_s13 = smov 16  }
  0x34   :  { %51 = dma.hbm_to_vmem [thread:$0]  %s781_s3, 4608, %s46_s18, [#allocation6], %s660_s0, %s660_s0, %s661_s13  }
  0x35   :  { %s662_s16 = smov [#allocation8]   ;;  %s603_s21 = scalar_lea.hbm %s783_s5, 5120 }
  0x36   :  { %s59_s17 = sshll.u32 %s662_s16, 4  ;;  %p604_p10 = scmp.ne.s32.totalorder %s783_s5, %s603_s21  ;;  %s60_s17 = int_to_ptr.vmem [resolvable:$true] %s59_s17 }
  0x37   :  { %p607_p11 = scmp.lt.u32.totalorder %s603_s21, %s783_s5 }
  0x39   :  { %p609_p12 = pnand %p607_p11, %p604_p10 }
  0x3b   :  { %612 = shalt.err (!%p609_p12)
}
  0x3c   :  { %s613_s1 = scalar_lea.vmem %s60_s17, 5120  ;;  %p618_p0 = scmp.lt.s32.totalorder %s60_s17, %s60_s17 }
  0x3d   :  { %p614_p13 = scmp.ne.s32.totalorder %s60_s17, %s613_s1  ;;  %p619_p1 = scmp.lt.s32.totalorder %s613_s1, %s613_s1 }
  0x3f   :  { %p620_p2 = por %p619_p1, %p618_p0 }
  0x41   :  { %p621_p3 = pnand %p620_p2, %p614_p13 }
  0x43   :  { %624 = shalt.err (!%p621_p3)
}
  0x44   :  { %65 = dma.hbm_to_vmem [thread:$0]  %s783_s5, 5120, %s60_s17, [#allocation9], %s660_s0, %s660_s0, %s661_s13  }
  0x45   :  { %647 = dma.done.wait [#allocation3], 128  }
  0x46   :  { %648 = vsyncadd [#allocation3], 4294967168 }
  0x47   :  { %649 = dma.done.wait [#allocation6], 4864  }
  0x48   :  { %650 = vsyncadd [#allocation6], 4294962432 }
  0x49   :  { %651 = dma.done.wait [#allocation9], 5120  }
  0x4a   :  { %652 = vsyncadd [#allocation9], 4294962176  ;;  %v663_v0 = vmov 0.0|0.0   ;;  %vm664_vm0 = vmmov 0   ;;  %v665_v1 = vmov 0.0   ;;  %v81_v2 = vld [vmem:[#allocation5] sm:$0xff] }
  0x4b   :  { %446 = vmatprep.subr.bf16.mxu1 %v663_v0  ;;  %443 = vmatprep.mubr.msk.f32.mxu1 %vm664_vm0, %v665_v1  ;;  %v82_v3 = vld [vmem:[#allocation5 + $0x8] sm:$0xff]  ;;  %v166_v5 = vld [vmem:[#allocation7 + $0x8] sm:$0xff]  ;;  %v165_v7 = vld [vmem:[#allocation7] sm:$0xff]  ;;  %vm90_vm1 = vcmask 130048   ;;  %vm338_vm2 = vcmask 261120  }
  0x4c   :  { %v447_v4 = vpack.c.bf16 %v82_v3, %v81_v2  ;;  %v168_v6 = vld [vmem:[#allocation7 + $0x18] sm:$0xff]  ;;  %v167_v9 = vld [vmem:[#allocation7 + $0x10] sm:$0xff]  ;;  %v170_v10 = vld [vmem:[#allocation7 + $0x28] sm:$0xff] }
  0x4d   :  { %v449_v8 = vpack.c.bf16 %v168_v6, %v166_v5  ;;  %v172_v11 = vld [vmem:[#allocation7 + $0x38] sm:$0xff]  ;;  %v80_v12 = vld [vmem:[#allocation2] sm:$0xff]  ;;  %v451_v13 = vpack.c.bf16 %v167_v9, %v165_v7  ;;  %v169_v15 = vld [vmem:[#allocation7 + $0x20] sm:$0xff] }
  0x4e   :  { %448 = vmatpush3.bf16.msra.mxu1 %v447_v4  ;;  %v453_v14 = vpack.c.bf16 %v172_v11, %v170_v10  ;;  %v171_v16 = vld [vmem:[#allocation7 + $0x30] sm:$0xff]  ;;  %v174_v17 = vld [vmem:[#allocation7 + $0x48] sm:$0xff]  ;;  %v176_v18 = vld [vmem:[#allocation7 + $0x58] sm:$0xff] }
  0x4f   :  { %450 = vmatprep.subr.bf16.mxu1 %v449_v8  ;;  %v455_v19 = vpack.c.bf16 %v171_v16, %v169_v15  ;;  %v457_v20 = vpack.c.bf16 %v176_v18, %v174_v17  ;;  %v173_v21 = vld [vmem:[#allocation7 + $0x40] sm:$0xff]  ;;  %v175_v22 = vld [vmem:[#allocation7 + $0x50] sm:$0xff]  ;;  %v178_v23 = vld [vmem:[#allocation7 + $0x68] sm:$0xff] }
  0x50   :  { %v180_v24 = vld [vmem:[#allocation7 + $0x78] sm:$0xff]  ;;  %v459_v25 = vpack.c.bf16 %v175_v22, %v173_v21  ;;  %v177_v27 = vld [vmem:[#allocation7 + $0x60] sm:$0xff]  ;;  %v179_v28 = vld [vmem:[#allocation7 + $0x70] sm:$0xff] }
  0x51   :  { %444 = vmatmul.mubr.msk.f32.vlgmr.msra.gmra.mrb[0].mxu1 %vm90_vm1, %v80_v12  ;;  %v461_v26 = vpack.c.bf16 %v180_v24, %v178_v23  ;;  %v182_v29 = vld [vmem:[#allocation7 + $0x88] sm:$0xff]  ;;  %v184_v30 = vld [vmem:[#allocation7 + $0x98] sm:$0xff]  ;;  %v463_v31 = vpack.c.bf16 %v179_v28, %v177_v27  ;;  %v181_v33 = vld [vmem:[#allocation7 + $0x80] sm:$0xff] }
  0x52   :  { %452 = vmatpush1.bf16.msra.mxu1 %v451_v13  ;;  %434 = vmatprep.mubr.msk.f32.mxu1 %vm90_vm1, %v80_v12  ;;  %v465_v32 = vpack.c.bf16 %v184_v30, %v182_v29  ;;  %v183_v34 = vld [vmem:[#allocation7 + $0x90] sm:$0xff]  ;;  %v186_v35 = vld [vmem:[#allocation7 + $0xa8] sm:$0xff]  ;;  %v188_v36 = vld [vmem:[#allocation7 + $0xb8] sm:$0xff] }
  0x53   :  { %454 = vmatprep.subr.bf16.mxu1 %v453_v14  ;;  %v467_v37 = vpack.c.bf16 %v183_v34, %v181_v33  ;;  %v469_v38 = vpack.c.bf16 %v188_v36, %v186_v35  ;;  %v185_v39 = vld [vmem:[#allocation7 + $0xa0] sm:$0xff]  ;;  %v187_v40 = vld [vmem:[#allocation7 + $0xb0] sm:$0xff]  ;;  %v190_v41 = vld [vmem:[#allocation7 + $0xc8] sm:$0xff] }
  0x54   :  { %v192_v42 = vld [vmem:[#allocation7 + $0xd8] sm:$0xff]  ;;  %v471_v43 = vpack.c.bf16 %v187_v40, %v185_v39  ;;  %v189_v45 = vld [vmem:[#allocation7 + $0xc0] sm:$0xff]  ;;  %v191_v46 = vld [vmem:[#allocation7 + $0xd0] sm:$0xff] }
  0x55   :  { %v473_v44 = vpack.c.bf16 %v192_v42, %v190_v41  ;;  %v194_v47 = vld [vmem:[#allocation7 + $0xe8] sm:$0xff]  ;;  %v196_v48 = vld [vmem:[#allocation7 + $0xf8] sm:$0xff]  ;;  %v475_v49 = vpack.c.bf16 %v191_v46, %v189_v45  ;;  %v193_v51 = vld [vmem:[#allocation7 + $0xe0] sm:$0xff] }
  0x56   :  { %456 = vmatpush1.bf16.msra.mxu1 %v455_v19  ;;  %v477_v50 = vpack.c.bf16 %v196_v48, %v194_v47  ;;  %v195_v52 = vld [vmem:[#allocation7 + $0xf0] sm:$0xff]  ;;  %v198_v54 = vld [vmem:[#allocation7 + $0x108] sm:$0xff]  ;;  %v200_v55 = vld [vmem:[#allocation7 + $0x118] sm:$0xff] }
  0x57   :  { %458 = vmatprep.subr.bf16.mxu1 %v457_v20  ;;  %v479_v53 = vpack.c.bf16 %v195_v52, %v193_v51  ;;  %v481_v56 = vpack.c.bf16 %v200_v55, %v198_v54  ;;  %v197_v57 = vld [vmem:[#allocation7 + $0x100] sm:$0xff]  ;;  %v199_v58 = vld [vmem:[#allocation7 + $0x110] sm:$0xff]  ;;  %v287_v60 = vld [vmem:[#allocation8 + $0x8] sm:$0xff] }
  0x58   :  { %v483_v59 = vpack.c.bf16 %v199_v58, %v197_v57  ;;  %v289_v61 = vld [vmem:[#allocation8 + $0x18] sm:$0xff]  ;;  %v286_v62 = vld [vmem:[#allocation8] sm:$0xff]  ;;  %v288_v0 = vld [vmem:[#allocation8 + $0x10] sm:$0xff] }
  0x59   :  { %v485_v63 = vpack.c.bf16 %v289_v61, %v287_v60  ;;  %v291_v1 = vld [vmem:[#allocation8 + $0x28] sm:$0xff]  ;;  %v293_v2 = vld [vmem:[#allocation8 + $0x38] sm:$0xff]  ;;  %v487_v3 = vpack.c.bf16 %v288_v0, %v286_v62  ;;  %v290_v5 = vld [vmem:[#allocation8 + $0x20] sm:$0xff]  ;;  %v203_v61 = vlaneseq }
  0x5a   :  { %460 = vmatpush1.bf16.msra.mxu1 %v459_v25  ;;  %v489_v4 = vpack.c.bf16 %v293_v2, %v291_v1  ;;  %v292_v6 = vld [vmem:[#allocation8 + $0x30] sm:$0xff]  ;;  %v295_v7 = vld [vmem:[#allocation8 + $0x48] sm:$0xff]  ;;  %v297_v8 = vld [vmem:[#allocation8 + $0x58] sm:$0xff] }
  0x5b   :  { %462 = vmatprep.subr.bf16.mxu1 %v461_v26  ;;  %486 = vmatprep.subr.bf16.mxu0 %v485_v63  ;;  %v491_v9 = vpack.c.bf16 %v292_v6, %v290_v5  ;;  %v493_v10 = vpack.c.bf16 %v297_v8, %v295_v7  ;;  %v294_v11 = vld [vmem:[#allocation8 + $0x40] sm:$0xff]  ;;  %v296_v12 = vld [vmem:[#allocation8 + $0x50] sm:$0xff]  ;;  %v299_v13 = vld [vmem:[#allocation8 + $0x68] sm:$0xff]  ;;  %v204_v62 = vshrl.u32 %v203_v61, 7 }
  0x5c   :  { %488 = vmatpush1.bf16.msra.mxu0 %v487_v3  ;;  %v301_v14 = vld [vmem:[#allocation8 + $0x78] sm:$0xff]  ;;  %v495_v15 = vpack.c.bf16 %v296_v12, %v294_v11  ;;  %v298_v17 = vld [vmem:[#allocation8 + $0x60] sm:$0xff]  ;;  %v300_v18 = vld [vmem:[#allocation8 + $0x70] sm:$0xff] }
  0x5d   :  { %490 = vmatprep.subr.bf16.mxu0 %v489_v4  ;;  %v497_v16 = vpack.c.bf16 %v301_v14, %v299_v13  ;;  %v303_v19 = vld [vmem:[#allocation8 + $0x88] sm:$0xff]  ;;  %v305_v20 = vld [vmem:[#allocation8 + $0x98] sm:$0xff]  ;;  %v499_v21 = vpack.c.bf16 %v300_v18, %v298_v17  ;;  %v302_v23 = vld [vmem:[#allocation8 + $0x80] sm:$0xff]  ;;  %v205_v63 = vsub.s32 0, %v204_v62  ;;  %v209_v1 = vsub.s32 1, %v204_v62 }
  0x5e   :  { %464 = vmatpush1.bf16.msra.mxu1 %v463_v31  ;;  %v501_v22 = vpack.c.bf16 %v305_v20, %v303_v19  ;;  %v304_v24 = vld [vmem:[#allocation8 + $0x90] sm:$0xff]  ;;  %v307_v25 = vld [vmem:[#allocation8 + $0xa8] sm:$0xff]  ;;  %v309_v26 = vld [vmem:[#allocation8 + $0xb8] sm:$0xff] }
  0x5f   :  { %466 = vmatprep.subr.bf16.mxu1 %v465_v32  ;;  %v503_v27 = vpack.c.bf16 %v304_v24, %v302_v23  ;;  %v505_v28 = vpack.c.bf16 %v309_v26, %v307_v25  ;;  %v306_v29 = vld [vmem:[#allocation8 + $0xa0] sm:$0xff]  ;;  %v308_v30 = vld [vmem:[#allocation8 + $0xb0] sm:$0xff]  ;;  %v311_v31 = vld [vmem:[#allocation8 + $0xc8] sm:$0xff] }
  0x60   :  { %492 = vmatpush1.bf16.msra.mxu0 %v491_v9  ;;  %v313_v32 = vld [vmem:[#allocation8 + $0xd8] sm:$0xff]  ;;  %v507_v33 = vpack.c.bf16 %v308_v30, %v306_v29  ;;  %v310_v35 = vld [vmem:[#allocation8 + $0xc0] sm:$0xff]  ;;  %v312_v36 = vld [vmem:[#allocation8 + $0xd0] sm:$0xff] }
  0x61   :  { %494 = vmatprep.subr.bf16.mxu0 %v493_v10  ;;  %v509_v34 = vpack.c.bf16 %v313_v32, %v311_v31  ;;  %v511_v39 = vpack.c.bf16 %v312_v36, %v310_v35  ;;  %v314_v41 = vld [vmem:[#allocation8 + $0xe0] sm:$0xff]  ;;  %v316_v42 = vld [vmem:[#allocation8 + $0xf0] sm:$0xff]  ;;  %v432_v47 = vld [vmem:[%s780_s2] ss:$0 sm:$0xff] }
  0x62   :  { %468 = vmatpush1.bf16.msra.mxu1 %v467_v37  ;;  %v315_v37 = vld [vmem:[#allocation8 + $0xe8] sm:$0xff]  ;;  %v515_v45 = vpack.c.bf16 %v316_v42, %v314_v41  ;;  %v318_v52 = vld [vmem:[#allocation8 + $0x100] sm:$0xff] }
  0x63   :  { %470 = vmatprep.subr.bf16.mxu1 %v469_v38  ;;  %v317_v38 = vld [vmem:[#allocation8 + $0xf8] sm:$0xff]  ;;  %v323_v55 = vld [vmem:[#allocation8 + $0x128] sm:$0xff]  ;;  %v322_v58 = vld [vmem:[#allocation8 + $0x120] sm:$0xff] }
  0x64   :  { %496 = vmatpush1.bf16.msra.mxu0 %v495_v15  ;;  %v513_v40 = vpack.c.bf16 %v317_v38, %v315_v37  ;;  %v201_v0 = vld [vmem:[%s782_s4] sm:$0x3]  ;;  %s666_s4 = smov [#allocation10]  }
  0x65   :  { %498 = vmatprep.subr.bf16.mxu0 %v497_v16  ;;  %v206_v2 = vrot.slane %v201_v0, %v205_v63  ;;  %v210_v3 = vrot.slane %v201_v0, %v209_v1  ;;  %v326_v10 = vld [vmem:[%s784_s6] sm:$0x3]  ;;  %s421_s30 = sshll.u32 %s666_s4, 4  ;;  %s422_s30 = int_to_ptr.vmem [resolvable:$true] %s421_s30 }
  0x66   :  { %472 = vmatpush1.bf16.msra.mxu1 %v471_v43  ;;  %v319_v43 = vld [vmem:[#allocation8 + $0x108] sm:$0xff]  ;;  %v331_v11 = vrot.slane %v326_v10, %v205_v63  ;;  %v335_v12 = vrot.slane %v326_v10, %v209_v1  ;;  %s625_s8 = scalar_lea.vmem %s422_s30, 256  ;;  %p630_p5 = scmp.lt.s32.totalorder %s422_s30, %s422_s30 }
  0x67   :  { %474 = vmatprep.subr.bf16.mxu1 %v473_v44  ;;  %v321_v44 = vld [vmem:[#allocation8 + $0x118] sm:$0xff]  ;;  %p626_p4 = scmp.ne.s32.totalorder %s422_s30, %s625_s8  ;;  %p631_p6 = scmp.lt.s32.totalorder %s625_s8, %s625_s8 }
  0x68   :  { %500 = vmatpush1.bf16.msra.mxu0 %v499_v21  ;;  %v517_v46 = vpack.c.bf16 %v321_v44, %v319_v43 }
  0x69   :  { %502 = vmatprep.subr.bf16.mxu0 %v501_v22  ;;  %p632_p7 = por %p631_p6, %p630_p5 }
  0x6a   :  { %476 = vmatpush1.bf16.msra.mxu1 %v475_v49 }
  0x6b   :  { %478 = vmatprep.subr.bf16.mxu1 %v477_v50  ;;  %p633_p8 = pnand %p632_p7, %p626_p4 }
  0x6c   :  { %504 = vmatpush1.bf16.msra.mxu0 %v503_v27 }
  0x6d   :  { %506 = vmatprep.subr.bf16.mxu0 %v505_v28 }
  0x6e   :  { %480 = vmatpush1.bf16.msra.mxu1 %v479_v53  ;;  %v320_v53 = vld [vmem:[#allocation8 + $0x110] sm:$0xff] }
  0x6f   :  { %482 = vmatprep.subr.bf16.mxu1 %v481_v56  ;;  %v519_v54 = vpack.c.bf16 %v320_v53, %v318_v52  ;;  %v325_v56 = vld [vmem:[#allocation8 + $0x138] sm:$0xff] }
  0x70   :  { %508 = vmatpush1.bf16.msra.mxu0 %v507_v33  ;;  %v521_v57 = vpack.c.bf16 %v325_v56, %v323_v55 }
  0x71   :  { %510 = vmatprep.subr.bf16.mxu0 %v509_v34 }
  0x72   :  { %484 = vmatpush1.bf16.msra.mxu1 %v483_v59  ;;  %v324_v59 = vld [vmem:[#allocation8 + $0x130] sm:$0xff] }
  0x73   :  { %v523_v60 = vpack.c.bf16 %v324_v59, %v322_v58 }
  0x74   :  { %512 = vmatpush1.bf16.msra.mxu0 %v511_v39 }
  0x75   :  { %514 = vmatprep.subr.bf16.mxu0 %v513_v40 }
  0x78   :  { %516 = vmatpush1.bf16.msra.mxu0 %v515_v45 }
  0x79   :  { %518 = vmatprep.subr.bf16.mxu0 %v517_v46 }
  0x7c   :  { %520 = vmatpush1.bf16.msra.mxu0 %v519_v54 }
  0x7d   :  { %522 = vmatprep.subr.bf16.mxu0 %v521_v57 }
  0x80   :  { %524 = vmatpush1.bf16.msra.mxu0 %v523_v60 }
 0x124   :  { %v160_v48 = vpop.f32.mrb[0].mxu1 }
 0x125   :  { %v161_v49 = vadd.f32 %v432_v47, %v160_v48  ;;  %v445_v50 = vpop.f32.mrb[1].mxu1 }
 0x127   :  { %v164_v51 = vmax.f32 %v161_v49, 0.0 }
 0x129   :  { %278 = vmatmul.mubr.f32.vlgmr.msra.gmra.mrb[2].mxu1 %v164_v51 }
 0x1fc   :  { %v279_v4 = vpop.f32.mrb[2].mxu1 }
 0x1fd   :  { %v280_v5 = vadd.f32 %v279_v4, %v206_v2  ;;  %v281_v6 = vpop.f32.mrb[3].mxu1 }
 0x1fe   :  { %v282_v7 = vadd.f32 %v281_v6, %v210_v3 }
 0x1ff   :  { %v284_v9 = vmax.f32 %v280_v5, 0.0 }
 0x200   :  { %v285_v8 = vmax.f32 %v282_v7, 0.0 }
 0x202   :  { %435 = vmatprep.mubr.msk.f32.mxu0 %vm338_vm2, %v285_v8 }
 0x203   :  { %407 = vmatmul.mubr.f32.vlgmr.msra.gmra.mrb[0].mxu0 %v284_v9 }
 0x2d6   :  { %v408_v13 = vpop.f32.mrb[0].mxu0 }
 0x2d7   :  { %v409_v14 = vadd.f32 %v408_v13, %v331_v11  ;;  %v410_v15 = vpop.f32.mrb[1].mxu0 }
 0x2d8   :  { %v411_v16 = vadd.f32 %v410_v15, %v335_v12 }
 0x2d9   :  { %413 = vst [vmem:[#allocation10] sm:$0xff] %v409_v14 }
 0x2da   :  { %414 = vst.msk [vmem:[#allocation10 + $0x8] sm:$0xff] %vm338_vm2, %v411_v16 }
 0x2db   :  { %636 = shalt.err (!%p633_p8)
}
 0x2dc   :  { %s637_s10 = scalar_lea.hbm %s785_s7, 256 }
 0x2dd   :  { %p638_p9 = scmp.ne.s32.totalorder %s785_s7, %s637_s10  ;;  %p641_p10 = scmp.lt.u32.totalorder %s637_s10, %s785_s7 }
 0x2df   :  { %p643_p11 = pnand %p641_p10, %p638_p9 }
 0x2e1   :  { %646 = shalt.err (!%p643_p11)
}
 0x2e2   :  { %424 = dma.vmem_to_hbm [thread:$0]  %s422_s30, 256, %s785_s7, [#allocation4]  }
 0x2e3   :  { %653 = dma.done.wait [#allocation4], 256  }
 0x2e4   :  { %654 = vsyncadd [#allocation4], 4294967040 }
 0x2e5   :  { %428 = vsyncpa [#allocation3], 1 }
 0x2e6   :  { %429 = vsyncpa [#allocation6], 1 }
 0x2e7   :  { %430 = vsyncpa [#allocation9], 1 }
 0x2e8   :  { %431 = vsyncpa [#allocation4], 1 }

</bundles_post_ra>
